<compile_context>
chip_gen: v5e
topology: v5e:2x2
jax: 0.10.0
libtpu: 0.0.40
codegen_flags: <defaults>
</compile_context>

<pallas_src>
import jax
import jax.numpy as jnp
from jax.experimental import pallas as pl
from jax.experimental.pallas import tpu as pltpu


def always_kernel(x_ref, p_ref, w_ref, o_ref):
    # x_ref: (TB, input_dim)   native-layout batch tile (lane-dense in input_dim)
    # p_ref: (T, input_dim, D) 0/1 gather matrices (VMEM-resident constant)
    # w_ref: (T, D)            sigmoid time-window (VMEM-resident constant)
    # o_ref: (TB, D)           lane-dense output slab
    x = x_ref[...]
    if x.dtype != jnp.float32:
        x = x.astype(jnp.float32)            # no-op for f32 inputs
    w = w_ref[...]                           # (T, D), tiny, already float32
    T = w.shape[0]

    sumlog = None
    for t in range(T):                       # short static loop -> fully unrolled
        # Gather x columns onto output columns for time step t (MXU is idle here).
        # HIGHEST precision keeps the 0/1-selection matmul exact in float32.
        xg = jnp.dot(x, p_ref[t],
                     preferred_element_type=jnp.float32,
                     precision=jax.lax.Precision.HIGHEST)          # (TB, D)
        lt = jnp.log(1.0 - (1.0 - xg) * w[t][None, :])             # (TB, D)
        sumlog = lt if sumlog is None else sumlog + lt

    # Exact divide (not pl.reciprocal(approx=True)) to hold the 1e-5 tolerance.
    o_ref[...] = (-1.0 / (-1.0 + sumlog)).astype(o_ref.dtype)


def always_forward(x, start_params, end_params, *, n, bin1, bin_t):
    """Pallas implementation of AlwaysLayer.forward (use_not=False)."""
    B, input_dim = x.shape
    assert input_dim % (bin1 * bin_t) == 0
    T = bin_t
    K = input_dim // (bin1 * T)
    G = K * bin1                      # temporal groups (k, j)
    D = G * n                         # == output_dim == n * input_dim / bin_t

    # --- tiny precomputed constants (kept VMEM-resident via constant index_map) ---
    # Window w[t, d] = sigmoid((t - start[d]) * (end[d] - t)),   shape (T, D).
    l = jnp.arange(T, dtype=jnp.float32)
    s = start_params.reshape(D).astype(jnp.float32)
    e = end_params.reshape(D).astype(jnp.float32)
    w = jax.nn.sigmoid((l[:, None] - s[None, :]) * (e[None, :] - l[:, None]))

    # Gather matrices p[t, c, d] = 1 iff input column c feeds output column d at step t:
    #   c = k*bin1*T + t*bin1 + j,   d = (k*bin1 + j)*n + num  (any num).
    c_idx = jnp.arange(input_dim)
    g_of_c = (c_idx // (bin1 * T)) * bin1 + (c_idx % bin1)       # group of column c
    t_of_c = (c_idx % (bin1 * T)) // bin1                        # time step of column c
    g_of_d = jnp.arange(D) // n                                  # group of output column d
    p = ((t_of_c[None, :, None] == jnp.arange(T)[:, None, None]) &
         (g_of_c[None, :, None] == g_of_d[None, None, :])).astype(jnp.float32)  # (T, in, D)

    # --- batch tiling with full VMEM accounting ---
    in_bytes = x.dtype.itemsize
    # per batch row: double-buffered x block + double-buffered out block
    #                + ~4 transient f32 slabs (xg / factor / log / running sum)
    row_bytes = 2 * input_dim * in_bytes + 2 * D * 4 + 4 * max(input_dim, D) * 4
    const_bytes = 2 * (T * input_dim * D + T * D) * 4            # p & w (double-buffered)
    budget = 28 * 1024 * 1024                                    # fits v5e/v6e/v7x scoped VMEM
    TB = max(8, (budget - const_bytes) // row_bytes)
    TB = min(TB, 2048)
    TB = (TB // 8) * 8                                           # sublane-aligned
    if B > 8:                                                    # >= 2 blocks -> both v7x TCs busy
        TB = min(TB, max(8, (((B + 1) // 2) + 7) // 8 * 8))
    TB = min(TB, ((B + 7) // 8) * 8)                             # don't over-pad tiny batches
    TB = max(TB, 8)

    num_blocks = pl.cdiv(B, TB)
    B_pad = num_blocks * TB
    x_pad = x
    if B_pad != B:
        # Pad with 1.0: factor = 1 - (1-1)*w = 1, log(1) = 0 -> finite; sliced off below.
        x_pad = jnp.pad(x, ((0, B_pad - B), (0, 0)), constant_values=1.0)

    out = pl.pallas_call(
        always_kernel,
        out_shape=jax.ShapeDtypeStruct((B_pad, D), jnp.float32),
        grid_spec=pltpu.PrefetchScalarGridSpec(
            num_scalar_prefetch=0,
            grid=(num_blocks,),
            in_specs=[
                pl.BlockSpec((TB, input_dim), lambda b: (b, 0)),      # native-layout x tile
                pl.BlockSpec((T, input_dim, D), lambda b: (0, 0, 0)),  # resident gather mats
                pl.BlockSpec((T, D), lambda b: (0, 0)),                # resident window
            ],
            out_specs=pl.BlockSpec((TB, D), lambda b: (b, 0)),         # lane-dense in D
        ),
        compiler_params=pltpu.CompilerParams(
            dimension_semantics=("parallel",),        # batch blocks shard across TCs on v7x
            vmem_limit_bytes=48 * 1024 * 1024,        # explicit; safe on v5e/v6e/v7x
        ),
    )(x_pad, p, w)

    return out[:B]


def always_ref(x, start_params, end_params, *, n, bin1, bin_t):
    """Pure-JAX transcription of the PyTorch forward, for verification."""
    outs = []
    l = jnp.arange(bin_t, dtype=jnp.float32)
    for k, i in enumerate(range(0, x.shape[1], bin1 * bin_t)):
        x_part = x[:, i:i + bin1 * bin_t]
        for j in range(bin1):
            x_input = x_part[:, j::bin1]                               # (B, T)
            for num in range(n):
                idx = k * bin1 * n + j * n + num
                Ws = start_params[idx]
                We = end_params[idx]
                W = jax.nn.sigmoid((l - Ws) * (We - l))[None, :]       # (1, T)
                X = 1.0 - (1.0 - x_input)[:, :, None] * W.T            # (B, T, 1)
                y = -1.0 / (-1.0 + jnp.sum(jnp.log(X), axis=1))        # (B, 1)
                outs.append(y)
    return jnp.concatenate(outs, axis=1)


if __name__ == "__main__":
    # Small configs: aligned batch, padded/tiled batch, and a lane-width output (D=32).
    configs = [
        dict(n=2, bin1=2, bin_t=4, K=2, B=16),   # input_dim=16, output_dim=8
        dict(n=3, bin1=2, bin_t=4, K=1, B=10),   # input_dim=8,  output_dim=6, padded batch
        dict(n=2, bin1=4, bin_t=4, K=4, B=24),   # input_dim=64, output_dim=32, 2 blocks
    ]
    key = jax.random.PRNGKey(0)
    for cfg in configs:
        n, bin1, bin_t, K, B = cfg["n"], cfg["bin1"], cfg["bin_t"], cfg["K"], cfg["B"]
        input_dim = K * bin1 * bin_t
        output_dim = n * input_dim // bin_t

        key, kx, ks, ke = jax.random.split(key, 4)
        # inputs in (0, 1) like soft truth values (keeps log() well-defined)
        x = jax.random.uniform(kx, (B, input_dim), jnp.float32,
                               minval=0.05, maxval=0.95)
        # parameter init mirroring (bin_t - 1) * torch.rand(output_dim)
        start_params = (bin_t - 1) * jax.random.uniform(ks, (output_dim,), jnp.float32)
        end_params = (bin_t - 1) * jax.random.uniform(ke, (output_dim,), jnp.float32)

        out = always_forward(x, start_params, end_params, n=n, bin1=bin1, bin_t=bin_t)
        out = jax.block_until_ready(out)

        ref = always_ref(x, start_params, end_params, n=n, bin1=bin1, bin_t=bin_t)
        assert out.shape == (B, output_dim)
        assert jnp.allclose(out, ref, rtol=1e-5, atol=1e-5), "mismatch vs reference"

    # TODO(synk): if the downstream consumer runs in bf16, cast at the o_ref write and
    # make out_shape bf16 to halve output-side HBM writes (kept f32 here to match torch).
    print("KERNEL_OK")
</pallas_src>

<mosaic_0001>
module attributes {stable_mosaic.version = 11 : i64} {
  func.func @always_kernel(%arg0: i32, %arg1: memref<8x16xf32, #tpu.memory_space<vmem>>, %arg2: memref<4x16x8xf32, #tpu.memory_space<vmem>>, %arg3: memref<4x8xf32, #tpu.memory_space<vmem>>, %arg4: memref<8x8xf32, #tpu.memory_space<vmem>>) attributes {dimension_semantics = [#tpu.dimension_semantics<parallel>], iteration_bounds = array<i64: 2>, scalar_prefetch = 0 : i64, scratch_operands = 0 : i64, tpu.core_type = #tpu.core_type<tc>, window_params = [{transform_indices = @transform_0, window_bounds = array<i64: 8, 16>}, {pipeline_mode = #tpu.pipeline_mode<synchronous>, transform_indices = @transform_1, window_bounds = array<i64: 4, 16, 8>}, {pipeline_mode = #tpu.pipeline_mode<synchronous>, transform_indices = @transform_2, window_bounds = array<i64: 4, 8>}, {transform_indices = @transform_3, window_bounds = array<i64: 8, 8>}]} {
    %c0 = arith.constant 0 : index
    %c0_0 = arith.constant 0 : index
    %0 = vector.load %arg1[%c0, %c0_0] : memref<8x16xf32, #tpu.memory_space<vmem>>, vector<8x16xf32>
    %c0_1 = arith.constant 0 : index
    %c0_2 = arith.constant 0 : index
    %1 = vector.load %arg3[%c0_1, %c0_2] : memref<4x8xf32, #tpu.memory_space<vmem>>, vector<4x8xf32>
    %c0_3 = arith.constant 0 : index
    %c0_4 = arith.constant 0 : index
    %c0_5 = arith.constant 0 : index
    %2 = vector.load %arg2[%c0_3, %c0_4, %c0_5] : memref<4x16x8xf32, #tpu.memory_space<vmem>>, vector<1x16x8xf32>
    %3 = vector.shape_cast %2 : vector<1x16x8xf32> to vector<16x8xf32>
    %cst = arith.constant dense<0.000000e+00> : vector<8x8xf32>
    %4 = tpu.matmul %0, %3, %cst {dimension_numbers = #tpu.dot_dimension_numbers<[1], [0], [0], [1], [0, 0, 1, 1], [], []>, precision = #tpu.contract_precision<fp32>} : vector<8x16xf32>, vector<16x8xf32>, vector<8x8xf32> -> vector<8x8xf32>
    %cst_6 = arith.constant 1.000000e+00 : f32
    %5 = vector.broadcast %cst_6 : f32 to vector<8x8xf32>
    %6 = arith.subf %5, %4 : vector<8x8xf32>
    %7 = vector.extract_strided_slice %1 {offsets = [0, 0], sizes = [1, 8], strides = [1, 1]} : vector<4x8xf32> to vector<1x8xf32>
    %8 = vector.shape_cast %7 : vector<1x8xf32> to vector<8xf32>
    %9 = vector.shape_cast %8 : vector<8xf32> to vector<1x8xf32>
    %10 = vector.broadcast %9 : vector<1x8xf32> to vector<8x8xf32>
    %11 = arith.mulf %6, %10 : vector<8x8xf32>
    %cst_7 = arith.constant 1.000000e+00 : f32
    %12 = vector.broadcast %cst_7 : f32 to vector<8x8xf32>
    %13 = arith.subf %12, %11 : vector<8x8xf32>
    %14 = math.log %13 : vector<8x8xf32>
    %c1 = arith.constant 1 : index
    %c0_8 = arith.constant 0 : index
    %c0_9 = arith.constant 0 : index
    %15 = vector.load %arg2[%c1, %c0_8, %c0_9] : memref<4x16x8xf32, #tpu.memory_space<vmem>>, vector<1x16x8xf32>
    %16 = vector.shape_cast %15 : vector<1x16x8xf32> to vector<16x8xf32>
    %cst_10 = arith.constant dense<0.000000e+00> : vector<8x8xf32>
    %17 = tpu.matmul %0, %16, %cst_10 {dimension_numbers = #tpu.dot_dimension_numbers<[1], [0], [0], [1], [0, 0, 1, 1], [], []>, precision = #tpu.contract_precision<fp32>} : vector<8x16xf32>, vector<16x8xf32>, vector<8x8xf32> -> vector<8x8xf32>
    %cst_11 = arith.constant 1.000000e+00 : f32
    %18 = vector.broadcast %cst_11 : f32 to vector<8x8xf32>
    %19 = arith.subf %18, %17 : vector<8x8xf32>
    %20 = vector.extract_strided_slice %1 {offsets = [1, 0], sizes = [1, 8], strides = [1, 1]} : vector<4x8xf32> to vector<1x8xf32>
    %21 = vector.shape_cast %20 : vector<1x8xf32> to vector<8xf32>
    %22 = vector.shape_cast %21 : vector<8xf32> to vector<1x8xf32>
    %23 = vector.broadcast %22 : vector<1x8xf32> to vector<8x8xf32>
    %24 = arith.mulf %19, %23 : vector<8x8xf32>
    %cst_12 = arith.constant 1.000000e+00 : f32
    %25 = vector.broadcast %cst_12 : f32 to vector<8x8xf32>
    %26 = arith.subf %25, %24 : vector<8x8xf32>
    %27 = math.log %26 : vector<8x8xf32>
    %28 = arith.addf %14, %27 : vector<8x8xf32>
    %c2 = arith.constant 2 : index
    %c0_13 = arith.constant 0 : index
    %c0_14 = arith.constant 0 : index
    %29 = vector.load %arg2[%c2, %c0_13, %c0_14] : memref<4x16x8xf32, #tpu.memory_space<vmem>>, vector<1x16x8xf32>
    %30 = vector.shape_cast %29 : vector<1x16x8xf32> to vector<16x8xf32>
    %cst_15 = arith.constant dense<0.000000e+00> : vector<8x8xf32>
    %31 = tpu.matmul %0, %30, %cst_15 {dimension_numbers = #tpu.dot_dimension_numbers<[1], [0], [0], [1], [0, 0, 1, 1], [], []>, precision = #tpu.contract_precision<fp32>} : vector<8x16xf32>, vector<16x8xf32>, vector<8x8xf32> -> vector<8x8xf32>
    %cst_16 = arith.constant 1.000000e+00 : f32
    %32 = vector.broadcast %cst_16 : f32 to vector<8x8xf32>
    %33 = arith.subf %32, %31 : vector<8x8xf32>
    %34 = vector.extract_strided_slice %1 {offsets = [2, 0], sizes = [1, 8], strides = [1, 1]} : vector<4x8xf32> to vector<1x8xf32>
    %35 = vector.shape_cast %34 : vector<1x8xf32> to vector<8xf32>
    %36 = vector.shape_cast %35 : vector<8xf32> to vector<1x8xf32>
    %37 = vector.broadcast %36 : vector<1x8xf32> to vector<8x8xf32>
    %38 = arith.mulf %33, %37 : vector<8x8xf32>
    %cst_17 = arith.constant 1.000000e+00 : f32
    %39 = vector.broadcast %cst_17 : f32 to vector<8x8xf32>
    %40 = arith.subf %39, %38 : vector<8x8xf32>
    %41 = math.log %40 : vector<8x8xf32>
    %42 = arith.addf %28, %41 : vector<8x8xf32>
    %c3 = arith.constant 3 : index
    %c0_18 = arith.constant 0 : index
    %c0_19 = arith.constant 0 : index
    %43 = vector.load %arg2[%c3, %c0_18, %c0_19] : memref<4x16x8xf32, #tpu.memory_space<vmem>>, vector<1x16x8xf32>
    %44 = vector.shape_cast %43 : vector<1x16x8xf32> to vector<16x8xf32>
    %cst_20 = arith.constant dense<0.000000e+00> : vector<8x8xf32>
    %45 = tpu.matmul %0, %44, %cst_20 {dimension_numbers = #tpu.dot_dimension_numbers<[1], [0], [0], [1], [0, 0, 1, 1], [], []>, precision = #tpu.contract_precision<fp32>} : vector<8x16xf32>, vector<16x8xf32>, vector<8x8xf32> -> vector<8x8xf32>
    %cst_21 = arith.constant 1.000000e+00 : f32
    %46 = vector.broadcast %cst_21 : f32 to vector<8x8xf32>
    %47 = arith.subf %46, %45 : vector<8x8xf32>
    %48 = vector.extract_strided_slice %1 {offsets = [3, 0], sizes = [1, 8], strides = [1, 1]} : vector<4x8xf32> to vector<1x8xf32>
    %49 = vector.shape_cast %48 : vector<1x8xf32> to vector<8xf32>
    %50 = vector.shape_cast %49 : vector<8xf32> to vector<1x8xf32>
    %51 = vector.broadcast %50 : vector<1x8xf32> to vector<8x8xf32>
    %52 = arith.mulf %47, %51 : vector<8x8xf32>
    %cst_22 = arith.constant 1.000000e+00 : f32
    %53 = vector.broadcast %cst_22 : f32 to vector<8x8xf32>
    %54 = arith.subf %53, %52 : vector<8x8xf32>
    %55 = math.log %54 : vector<8x8xf32>
    %56 = arith.addf %42, %55 : vector<8x8xf32>
    %cst_23 = arith.constant -1.000000e+00 : f32
    %57 = vector.broadcast %cst_23 : f32 to vector<8x8xf32>
    %58 = arith.addf %57, %56 : vector<8x8xf32>
    %cst_24 = arith.constant -1.000000e+00 : f32
    %59 = vector.broadcast %cst_24 : f32 to vector<8x8xf32>
    %60 = arith.divf %59, %58 : vector<8x8xf32>
    %c0_25 = arith.constant 0 : index
    %c0_26 = arith.constant 0 : index
    %61 = vector.load %arg4[%c0_25, %c0_26] : memref<8x8xf32, #tpu.memory_space<vmem>>, vector<8x8xf32>
    tpu.vector_store %arg4[%c0_25, %c0_26], %60 {strides = array<i32>} : memref<8x8xf32, #tpu.memory_space<vmem>>, vector<8x8xf32>,
    return
  }
  func.func @transform_0(%arg0: i32) -> (i32, i32) {
    %c0_i32 = arith.constant 0 : i32
    %c0_i32_0 = arith.constant 0 : i32
    return %arg0, %c0_i32 : i32, i32
  }
  func.func @transform_1(%arg0: i32) -> (i32, i32, i32) {
    %c0_i32 = arith.constant 0 : i32
    %c0_i32_0 = arith.constant 0 : i32
    %c0_i32_1 = arith.constant 0 : i32
    %c0_i32_2 = arith.constant 0 : i32
    return %c0_i32, %c0_i32_0, %c0_i32_1 : i32, i32, i32
  }
  func.func @transform_2(%arg0: i32) -> (i32, i32) {
    %c0_i32 = arith.constant 0 : i32
    %c0_i32_0 = arith.constant 0 : i32
    %c0_i32_1 = arith.constant 0 : i32
    return %c0_i32, %c0_i32_0 : i32, i32
  }
  func.func @transform_3(%arg0: i32) -> (i32, i32) {
    %c0_i32 = arith.constant 0 : i32
    %c0_i32_0 = arith.constant 0 : i32
    return %arg0, %c0_i32 : i32, i32
  }
}

</mosaic_0001>

<bundles_post_ra>
// kernel: tpu_custom_call.1
= control target key start
LH: loop header
LB: loop body
LE: loop exit
PB: predicated region body
PF: predicated region fallthrough
CT: control target
= control target key end

     0   :  { %s978_s12 = smov 0   ;;  %s1099_s0 = inlined_call_operand.vmem [shape: f32[16,16], index: 0, kind: input, shape index: {}]   ;;  %s1100_s1 = inlined_call_operand.vmem [shape: f32[4,16,8], index: 1, kind: input, shape index: {}]   ;;  %s1101_s2 = inlined_call_operand.vmem [shape: f32[4,8], index: 2, kind: input, shape index: {}]   ;;  %s1102_s3 = inlined_call_operand.vmem [shape: f32[16,8], index: 3, kind: output, shape index: {}]  }
   0x1 LB: > { %s917_s13 = sadd.s32 4294967295, %s956_s12   ;;  %p921_p0 = scmp.ge.s32.totalorder %s956_s12, 1  ;;  %s956_s12 = sphi %s978_s12, %s13_s12  }
   0x2   : > { %p136_p1 = scmp.lt.s32.totalorder %s956_s12, 3 }
   0x4   : > { %p137_p2 = pnand %p921_p0, %p136_p1 }
   0x5   : > { %p158_p3 = scmp.lt.s32.totalorder (!%p137_p2), %s917_s13, 1 }
   0x6   : > { %140 = sbr.rel (%p137_p2) target bundleno = 240 (0xf0), region = 32 }
   0xb   : > { %v169_v0 = vld [vmem:[%s1100_s1 + $0x8] sm:$0xff]  ;;  %v168_v1 = vld [vmem:[%s1100_s1] sm:$0xff]  ;;  %v925_v2 = vld [vmem:[%s1100_s1 + $0x18] sm:$0xff]  ;;  %s1104_s13 = smov (!%p158_p3, %s917_s13), 1  ;;  %vm170_vm0 = vcmask 130048   ;;  %vm862_vm5 = vcmask 64512  }
   0xc   : > { %v188_v3 = vand.u32 4294901760, %v169_v0  ;;  %v995_v4 = vand.u32 4294901760, %v168_v1  ;;  %v997_v5 = vand.u32 4294901760, %v925_v2  ;;  %v924_v6 = vld [vmem:[%s1100_s1 + $0x10] sm:$0xff]  ;;  %v927_v7 = vld [vmem:[%s1100_s1 + $0x28] sm:$0xff]  ;;  %v926_v10 = vld [vmem:[%s1100_s1 + $0x20] sm:$0xff] }
   0xd   : > { %v1007_v8 = vand.u32 4294901760, %v924_v6  ;;  %v1009_v9 = vand.u32 4294901760, %v927_v7  ;;  %s922_s26 = sshll.u32 %s1104_s13, 3  ;;  %v1024_v18 = vand.u32 4294901760, %v926_v10  ;;  %v929_v28 = vld [vmem:[%s1100_s1 + $0x38] sm:$0xff]  ;;  %v928_v35 = vld [vmem:[%s1100_s1 + $0x30] sm:$0xff] }
   0xe   : > { %v216_v11 = vsub.f32 %v169_v0, %v188_v3  ;;  %v222_v12 = vsub.f32 %v168_v1, %v995_v4  ;;  %273 = vmatpush.msra.mxu3 %v188_v3  ;;  %189 = vmatpush.msra.mxu0 %v188_v3  ;;  %v384_v13 = vsub.f32 %v925_v2, %v997_v5  ;;  %s161_s29 = scalar_lea.vmem %s1099_s0, %s922_s26  ;;  %v694_v37 = vand.u32 4294901760, %v929_v28  ;;  %s165_s11 = scalar_lea.vmem %s1102_s3, %s922_s26 }
   0xf   : > { %v390_v14 = vsub.f32 %v924_v6, %v1007_v8  ;;  %v166_v19 = vld [vmem:[%s161_s29] sm:$0xff]  ;;  %v1028_v21 = vsub.f32 %v927_v7, %v1009_v9  ;;  %v1037_v32 = vsub.f32 %v926_v10, %v1024_v18  ;;  %v696_v40 = vand.u32 4294901760, %v928_v35 }
  0x10   : > { %248 = vmatpush.msra.mxu2 %v216_v11  ;;  %v217_v15 = vand.u32 4294901760, %v216_v11  ;;  %275 = vmatpush.msra.mxu3 %v995_v4  ;;  %v223_v16 = vand.u32 4294901760, %v222_v12  ;;  %v385_v17 = vand.u32 4294901760, %v384_v13  ;;  %v172_v22 = vsel %vm170_vm0, %v166_v19, 0 }
  0x11   : > { %191 = vmatpush.msra.mxu0 %v995_v4  ;;  %v391_v20 = vand.u32 4294901760, %v390_v14  ;;  %v1030_v26 = vand.u32 4294901760, %v172_v22  ;;  %v554_v36 = vand.u32 4294901760, %v1028_v21  ;;  %v560_v39 = vand.u32 4294901760, %v1037_v32 }
  0x12   : > { %251 = vmatpush.msra.mxu2 %v222_v12  ;;  %v218_v23 = vsub.f32 %v216_v11, %v217_v15  ;;  %v224_v24 = vsub.f32 %v222_v12, %v223_v16  ;;  %v386_v25 = vsub.f32 %v384_v13, %v385_v17  ;;  %v722_v43 = vsub.f32 %v929_v28, %v694_v37 }
  0x13   : > { %300 = vmatpush.msrb.mxu0 %v217_v15  ;;  %v392_v27 = vsub.f32 %v390_v14, %v391_v20  ;;  %v1040_v33 = vsub.f32 %v172_v22, %v1030_v26  ;;  %v555_v42 = vsub.f32 %v1028_v21, %v554_v36  ;;  %v561_v45 = vsub.f32 %v1037_v32, %v560_v39 }
  0x14   : > { %357 = vmatpush.msrb.mxu2 %v997_v5  ;;  %v219_v29 = vand.u32 4294901760, %v218_v23  ;;  %v225_v30 = vand.u32 4294901760, %v224_v24  ;;  %v387_v31 = vand.u32 4294901760, %v386_v25  ;;  %v728_v46 = vsub.f32 %v928_v35, %v696_v40  ;;  %v167_v23 = vld [vmem:[%s1101_s2] sm:$0xf] }
  0x15   : > { %304 = vmatpush.msrb.mxu0 %v223_v16  ;;  %v393_v34 = vand.u32 4294901760, %v392_v27  ;;  %254 = vmatmul.f32.vlgmr.msra.gmra.mxu2 %v1040_v33  ;;  %v1049_v38 = vand.u32 4294901760, %v1040_v33  ;;  %v556_v47 = vand.u32 4294901760, %v555_v42  ;;  %v723_v48 = vand.u32 4294901760, %v722_v43 }
  0x16   : > { %359 = vmatpush.msrb.mxu2 %v1007_v8  ;;  %220 = vmatpush.msra.mxu1 %v219_v29  ;;  %v562_v49 = vand.u32 4294901760, %v561_v45  ;;  %v729_v50 = vand.u32 4294901760, %v728_v46  ;;  %v334_v29 = vperm.slane %v167_v23, 0 }
  0x17   : > { %388 = vmatpush.msrb.mxu3 %v387_v31  ;;  %v195_v41 = vsub.f32 %v1040_v33, %v1049_v38  ;;  %v724_v51 = vsub.f32 %v722_v43, %v723_v48 }
  0x18   : > { %226 = vmatpush.msra.mxu1 %v225_v30  ;;  %279 = vmatmul.f32.vlgmr.msra.gmra.mxu3 %v1049_v38  ;;  %v730_v52 = vsub.f32 %v728_v46, %v729_v50 }
  0x19   : > { %394 = vmatpush.msrb.mxu3 %v393_v34  ;;  %228 = vmatmul.f32.vlgmr.msra.gmra.mxu1 %v1030_v26  ;;  %v196_v44 = vand.u32 4294901760, %v195_v41  ;;  %v725_v53 = vand.u32 4294901760, %v724_v51 }
  0x1a   : > { %325 = vmatpush.msrb.mxu1 %v188_v3  ;;  %468 = vmatpush.msra.mxu2 %v385_v17  ;;  %v731_v54 = vand.u32 4294901760, %v730_v52 }
  0x1b   : > { %493 = vmatpush.msra.mxu3 %v997_v5  ;;  %197 = vmatmul.f32.vlgmr.msra.gmra.mxu0 %v196_v44 }
  0x1c   : > { %327 = vmatpush.msrb.mxu1 %v995_v4  ;;  %472 = vmatpush.msra.mxu2 %v391_v20 }
  0x1d   : > { %416 = vmatpush.msra.mxu0 %v384_v13  ;;  %495 = vmatpush.msra.mxu3 %v1007_v8 }
  0x1e   : > { %441 = vmatpush.msra.mxu1 %v997_v5  ;;  %365 = vmatmul.f32.vlgmr.msrb.gmra.mxu2 %v196_v44 }
  0x1f   : > { %419 = vmatpush.msra.mxu0 %v390_v14  ;;  %585 = vmatpush.msrb.mxu2 %v1028_v21 }
  0x20   : > { %443 = vmatpush.msra.mxu1 %v1007_v8  ;;  %396 = vmatmul.f32.vlgmr.msrb.gmra.mxu3 %v1030_v26 }
  0x21   : > { %329 = vmatmul.f32.vlgmr.msrb.gmra.mxu1 %v1030_v26  ;;  %610 = vmatpush.msrb.mxu3 %v1009_v9 }
  0x22   : > { %557 = vmatpush.msrb.mxu1 %v556_v47  ;;  %588 = vmatpush.msrb.mxu2 %v1037_v32  ;;  %v671_v32 = vperm.slane %v167_v23, 2 }
  0x23   : > { %612 = vmatpush.msrb.mxu3 %v1024_v18  ;;  %306 = vmatmul.f32.vlgmr.msrb.gmra.mxu0 %v1030_v26 }
  0x24   : > { %563 = vmatpush.msrb.mxu1 %v562_v49  ;;  %526 = vmatpush.msrb.mxu0 %v1009_v9 }
  0x26   : > { %474 = vmatmul.f32.vlgmr.msra.gmra.mxu2 %v1030_v26  ;;  %528 = vmatpush.msrb.mxu0 %v1024_v18 }
  0x27   : > { %695 = vmatpush.msra.mxu2 %v694_v37 }
  0x28   : > { %497 = vmatmul.f32.vlgmr.msra.gmra.mxu3 %v1030_v26 }
  0x29   : > { %447 = vmatmul.f32.vlgmr.msra.gmra.mxu1 %v1049_v38  ;;  %726 = vmatpush.msra.mxu3 %v725_v53 }
  0x2a   : > { %662 = vmatpush.msra.mxu1 %v1009_v9  ;;  %697 = vmatpush.msra.mxu2 %v696_v40 }
  0x2b   : > { %732 = vmatpush.msra.mxu3 %v731_v54  ;;  %422 = vmatmul.f32.vlgmr.msra.gmra.mxu0 %v1040_v33 }
  0x2c   : > { %664 = vmatpush.msra.mxu1 %v1024_v18  ;;  %637 = vmatpush.msra.mxu0 %v554_v36 }
  0x2e   : > { %591 = vmatmul.f32.vlgmr.msrb.gmra.mxu2 %v1040_v33  ;;  %641 = vmatpush.msra.mxu0 %v560_v39 }
  0x2f   : > { %806 = vmatpush.msrb.mxu2 %v723_v48  ;;  %v840_v48 = vperm.slane %v167_v23, 3 }
  0x30   : > { %616 = vmatmul.f32.vlgmr.msrb.gmra.mxu3 %v1049_v38 }
  0x31   : > { %565 = vmatmul.f32.vlgmr.msrb.gmra.mxu1 %v1030_v26  ;;  %831 = vmatpush.msrb.mxu3 %v694_v37 }
  0x32   : > { %779 = vmatpush.msrb.mxu1 %v694_v37  ;;  %810 = vmatpush.msrb.mxu2 %v729_v50 }
  0x33   : > { %833 = vmatpush.msrb.mxu3 %v696_v40  ;;  %534 = vmatmul.f32.vlgmr.msrb.gmra.mxu0 %v196_v44 }
  0x34   : > { %781 = vmatpush.msrb.mxu1 %v696_v40  ;;  %754 = vmatpush.msrb.mxu0 %v722_v43 }
  0x36   : > { %703 = vmatmul.f32.vlgmr.msra.gmra.mxu2 %v196_v44  ;;  %757 = vmatpush.msrb.mxu0 %v728_v46 }
  0x38   : > { %734 = vmatmul.f32.vlgmr.msra.gmra.mxu3 %v1030_v26 }
  0x39   : > { %666 = vmatmul.f32.vlgmr.msra.gmra.mxu1 %v1030_v26 }
  0x3b   : > { %643 = vmatmul.f32.vlgmr.msra.gmra.mxu0 %v1030_v26 }
  0x3e   : > { %812 = vmatmul.f32.vlgmr.msrb.gmra.mxu2 %v1030_v26 }
  0x40   : > { %835 = vmatmul.f32.vlgmr.msrb.gmra.mxu3 %v1030_v26  ;;  %v502_v26 = vperm.slane %v167_v23, 1 }
  0x41   : > { %785 = vmatmul.f32.vlgmr.msrb.gmra.mxu1 %v1049_v38 }
  0x43   : > { %760 = vmatmul.f32.vlgmr.msrb.gmra.mxu0 %v1040_v33 }
  0x96   : > { %v229_v55 = vpop.f32.mrf.mxu1 }
  0x98   : > { %v198_v56 = vpop.f32.mrf.mxu0  ;;  %v255_v57 = vpop.f32.mrf.mxu2 }
  0x99   : > { %v230_v3 = vadd.f32 %v229_v55, %v198_v56 }
  0x9b   : > { %v280_v58 = vpop.f32.mrf.mxu3  ;;  %v256_v6 = vadd.f32 %v255_v57, %v230_v3 }
  0x9d   : > { %v281_v12 = vadd.f32 %v280_v58, %v256_v6 }
  0x9e   : > { %v330_v59 = vpop.f32.mrf.mxu1 }
  0xa0   : > { %v307_v60 = vpop.f32.mrf.mxu0 }
  0xa1   : > { %v366_v61 = vpop.f32.mrf.mxu2  ;;  %v308_v16 = vadd.f32 %v307_v60, %v281_v12 }
  0xa3   : > { %v397_v62 = vpop.f32.mrf.mxu3  ;;  %v331_v20 = vadd.f32 %v330_v59, %v308_v16 }
  0xa4   : > { %v398_v2 = vadd.f32 %v397_v62, %v366_v61 }
  0xa5   : > { %v333_v28 = vsub.f32 1.0, %v331_v20 }
  0xa6   : > { %v448_v63 = vpop.f32.mrf.mxu1 }
  0xa7   : > { %v335_v35 = vmul.f32 %v334_v29, %v333_v28 }
  0xa8   : > { %v423_v0 = vpop.f32.mrf.mxu0 }
  0xa9   : > { %v475_v1 = vpop.f32.mrf.mxu2  ;;  %v424_v5 = vadd.f32 %v423_v0, %v398_v2  ;;  %v336_v43 = vsub.f32 1.0, %v335_v35 }
  0xab   : > { %v498_v4 = vpop.f32.mrf.mxu3  ;;  %v449_v8 = vadd.f32 %v448_v63, %v424_v5 }
  0xad   : > { %v476_v14 = vadd.f32 %v475_v1, %v449_v8 }
  0xae   : > { %v566_v7 = vpop.f32.mrf.mxu1 }
  0xaf   : > { %v499_v18 = vadd.f32 %v498_v4, %v476_v14 }
  0xb0   : > { %v535_v9 = vpop.f32.mrf.mxu0 }
  0xb1   : > { %v592_v10 = vpop.f32.mrf.mxu2  ;;  %v567_v11 = vadd.f32 %v566_v7, %v535_v9  ;;  %v501_v25 = vsub.f32 1.0, %v499_v18 }
  0xb3   : > { %v617_v13 = vpop.f32.mrf.mxu3  ;;  %v593_v15 = vadd.f32 %v592_v10, %v567_v11  ;;  %v503_v33 = vmul.f32 %v502_v26, %v501_v25 }
  0xb5   : > { %v618_v19 = vadd.f32 %v617_v13, %v593_v15  ;;  %v504_v41 = vsub.f32 1.0, %v503_v33 }
  0xb6   : > { %v667_v17 = vpop.f32.mrf.mxu1 }
  0xb7   : > { %940 = vlog2.f32 %v504_v41 }
  0xb8   : > { %v644_v21 = vpop.f32.mrf.mxu0  ;;  %942 = vlog2.f32 %v336_v43 }
  0xb9   : > { %v704_v22 = vpop.f32.mrf.mxu2  ;;  %v645_v24 = vadd.f32 %v644_v21, %v618_v19 }
  0xbb   : > { %v668_v27 = vadd.f32 %v667_v17, %v645_v24  ;;  %v735_v30 = vpop.f32.mrf.mxu3 }
  0xbc   : > { %v736_v34 = vadd.f32 %v735_v30, %v704_v22 }
  0xbd   : > { %v670_v31 = vsub.f32 1.0, %v668_v27  ;;  %v941_v51 = vpop.eup %940 }
  0xbe   : > { %v786_v37 = vpop.f32.mrf.mxu1  ;;  %v943_v53 = vpop.eup %942  ;;  %v506_v55 = vmul.f32 0.6931472, %v941_v51 }
  0xbf   : > { %v672_v38 = vmul.f32 %v671_v32, %v670_v31  ;;  %v338_v56 = vmul.f32 0.6931472, %v943_v53 }
  0xc0   : > { %v761_v36 = vpop.f32.mrf.mxu0 }
  0xc1   : > { %v762_v39 = vadd.f32 %v761_v36, %v736_v34  ;;  %v813_v40 = vpop.f32.mrf.mxu2  ;;  %v673_v45 = vsub.f32 1.0, %v672_v38  ;;  %v507_v58 = vadd.f32 %v506_v55, %v338_v56 }
  0xc3   : > { %v787_v42 = vadd.f32 %v786_v37, %v762_v39  ;;  %v836_v44 = vpop.f32.mrf.mxu3  ;;  %944 = vlog2.f32 %v673_v45 }
  0xc5   : > { %v814_v46 = vadd.f32 %v813_v40, %v787_v42 }
  0xc7   : > { %v837_v47 = vadd.f32 %v836_v44, %v814_v46 }
  0xc9   : > { %v839_v49 = vsub.f32 1.0, %v837_v47  ;;  %v945_v54 = vpop.eup %944 }
  0xca   : > { %v675_v57 = vmul.f32 0.6931472, %v945_v54 }
  0xcb   : > { %v841_v50 = vmul.f32 %v840_v48, %v839_v49 }
  0xcc   : > { %v676_v60 = vadd.f32 %v675_v57, %v507_v58 }
  0xcd   : > { %v842_v52 = vsub.f32 1.0, %v841_v50 }
  0xcf   : > { %946 = vlog2.f32 %v842_v52 }
  0xd5   : > { %v947_v59 = vpop.eup %946 }
  0xd6   : > { %v844_v61 = vmul.f32 0.6931472, %v947_v59 }
  0xd8   : > { %v845_v62 = vadd.f32 %v844_v61, %v676_v60 }
  0xda   : > { %v846_v63 = vadd.f32 -1.0, %v845_v62 }
  0xdc   : > { %948 = vrcp.f32 %v846_v63  ;;  %v858_v3 = vand.u32 2147483648, %v846_v63  ;;  %v856_v5 = vand.u32 2147483647, %v846_v63  ;;  %vm852_vm2 = vweird.f32 %v846_v63 }
  0xde   : > { %v859_v7 = vor.u32 1.1754944e-38, %v858_v3  ;;  %vm857_vm4 = vcmp.eq.f32.partialorder %v856_v5, 8.507059e+37 }
  0xe2   : > { %v949_v0 = vpop.eup %948 }
  0xe3   : > { %v848_v1 = vmul.f32 %v949_v0, %v846_v63  ;;  %vm853_vm1 = vweird.f32 %v949_v0 }
  0xe4   : > { %vm854_vm3 = vmor %vm852_vm2, %vm853_vm1 }
  0xe5   : > { %v849_v2 = vsub.f32 1.0, %v848_v1 }
  0xe7   : > { %v850_v4 = vmul.f32 %v949_v0, %v849_v2 }
  0xe9   : > { %v851_v6 = vadd.f32 %v949_v0, %v850_v4 }
  0xeb   : > { %v855_v8 = vsel %vm854_vm3, %v949_v0, %v851_v6 }
  0xec   : > { %v860_v9 = vsel %vm857_vm4, %v859_v7, %v855_v8 }
  0xed   : > { %v861_v10 = vmul.f32 -1.0, %v860_v9 }
  0xef   : > { %863 = vst.msk [vmem:[%s165_s11] sm:$0xff] %vm862_vm5, %v861_v10 }
  0xf0 PF: > { %s13_s12 = sadd.s32 1, %s956_s12  }
  0xf1   : > { %p10_p4 = scmp.ge.s32.totalorder %s13_s12, 4  }
  0xf3   :  { %12 = sbr.rel (!%p10_p4) target bundleno = 1 (0x1), region = 65 }

</bundles_post_ra>
